<compile_context>
chip_gen: v5e
topology: v5e:2x2
jax: 0.10.0
libtpu: 0.0.40
codegen_flags: <defaults>
</compile_context>

<pallas_src>
import math

import jax
import jax.numpy as jnp
from jax.experimental import pallas as pl
from jax.experimental.pallas import tpu as pltpu


def _make_mha_kernel(H, D, S, Tq, compute_dtype, with_attn):
    scale = 1.0 / math.sqrt(D)
    exact_softmax = with_attn  # stored weights must sum to 1 exactly

    def kernel(x_ref, mask_ref,
               wq_ref, bq_ref, wk_ref, bk_ref, wv_ref, bv_ref,
               wo_ref, bo_ref, *rest):
        if with_attn:
            out_ref, attn_ref, k_sc, v_sc = rest
        else:
            out_ref, k_sc, v_sc = rest
            attn_ref = None

        # ---- K/V projection: once per batch element (query axis sequential) --
        @pl.when(pl.program_id(1) == 0)
        def _():
            xkv = jnp.broadcast_to(x_ref[0][None], (H, S, D))        # (H, S, D)
            k = jnp.einsum('hsd,hde->hse', xkv, wk_ref[...],
                           preferred_element_type=jnp.float32) + bk_ref[...]
            v = jnp.einsum('hsd,hde->hse', xkv, wv_ref[...],
                           preferred_element_type=jnp.float32) + bv_ref[...]
            k_sc[...] = k.astype(compute_dtype)
            v_sc[...] = v.astype(compute_dtype)

        # ---- Q projection for the current query tile (sliced from x block) --
        q0 = pl.multiple_of(pl.program_id(1) * Tq, Tq)
        xq = jnp.broadcast_to(x_ref[0, pl.ds(q0, Tq), :][None], (H, Tq, D))
        q = (jnp.einsum('htd,hde->hte', xq, wq_ref[...],
                        preferred_element_type=jnp.float32)
             + bq_ref[...]).astype(compute_dtype)                    # (H, Tq, D)

        # ---- scores + numerically stable softmax (f32), all heads at once ---
        neg = mask_ref[0, 0] * (-1000000000.0)                       # (Tq, S) f32
        s = jnp.einsum('hqd,hkd->hqk', q, k_sc[...],
                       preferred_element_type=jnp.float32) * scale
        s = s + neg[None, :, :]                                      # (H, Tq, S)
        m = jnp.max(s, axis=-1, keepdims=True)
        e = jnp.exp(s - m)
        denom = jnp.sum(e, axis=-1, keepdims=True)
        if exact_softmax:
            w = e / denom                                  # exact (stored weights)
        else:
            w = e * pl.reciprocal(denom, approx=True)      # EUP slot, context only

        if attn_ref is not None:
            attn_ref[0] = w.astype(attn_ref.dtype)

        # ---- context + single output projection (contraction K = H*D) -------
        ctx = jnp.einsum('hqk,hkd->hqd', w.astype(compute_dtype), v_sc[...],
                         preferred_element_type=jnp.float32)         # (H, Tq, D)
        ctx_cat = jnp.concatenate(
            [ctx[h].astype(compute_dtype) for h in range(H)], axis=-1)  # (Tq, H*D)
        out = jnp.dot(ctx_cat, wo_ref[...],
                      preferred_element_type=jnp.float32) + bo_ref[...]
        out_ref[0] = out.astype(out_ref.dtype)

    return kernel


def multi_head_attention(x, mask, params, *, H, D, q_block=128,
                         compute_dtype=jnp.bfloat16, return_attn=True,
                         attn_dtype=jnp.float32):
    """x: (B, S, D) f32, mask: (B, 1, S, S) additive mask (1 = masked).
    Returns (output (B, S, D) f32, attention_weights (B, H, S, S) | None)."""
    B, S, Din = x.shape
    assert Din == D, "self-attention: input feature dim must equal D"
    HD = H * D
    wq, bq, wk, bk, wv, bv, wo, bo = params
    cd = compute_dtype

    # Head-major weight layout: (D, H*D) -> (H, D, D); biases -> (H, 1, D) f32.
    def head_major(w):
        return jnp.transpose(w.reshape(Din, H, D), (1, 0, 2)).astype(cd)

    def head_bias(b):
        return b.reshape(H, 1, D).astype(jnp.float32)

    wq_h, wk_h, wv_h = head_major(wq), head_major(wk), head_major(wv)
    bq_h, bk_h, bv_h = head_bias(bq), head_bias(bk), head_bias(bv)
    wo_c = wo.astype(cd)                                # (H*D, D)
    bo_f = bo.reshape(1, D).astype(jnp.float32)

    x_c = x.astype(cd)
    mask_f = mask.astype(jnp.float32)   # keep f32: exact for arbitrary additive masks

    # Query tiling (cap at q_block; keep default 128 so the attn block +
    # K/V scratch fit v7x's 64 MiB; raise on v6e/v5e for long S if desired).
    Tq = S if S <= q_block else q_block
    assert S % Tq == 0, "sequence length must be a multiple of the query block"
    n_q = S // Tq

    kernel = _make_mha_kernel(H, D, S, Tq, cd, return_attn)

    const = lambda shape: pl.BlockSpec(shape, lambda b, qi: (0,) * len(shape))

    in_specs = [
        pl.BlockSpec((1, S, D), lambda b, qi: (b, 0, 0)),          # x (full seq)
        pl.BlockSpec((1, 1, Tq, S), lambda b, qi: (b, 0, qi, 0)),  # additive mask
        const((H, Din, D)),   # wq
        const((H, 1, D)),     # bq
        const((H, Din, D)),   # wk
        const((H, 1, D)),     # bk
        const((H, Din, D)),   # wv
        const((H, 1, D)),     # bv
        const((HD, D)),       # wo
        const((1, D)),        # bo
    ]

    out_shape = [jax.ShapeDtypeStruct((B, S, D), jnp.float32)]
    out_specs = [pl.BlockSpec((1, Tq, D), lambda b, qi: (b, qi, 0))]
    if return_attn:
        out_shape.append(jax.ShapeDtypeStruct((B, H, S, S), attn_dtype))
        out_specs.append(pl.BlockSpec((1, H, Tq, S), lambda b, qi: (b, 0, qi, 0)))

    scratch_shapes = [pltpu.VMEM((H, S, D), cd),   # K, head-major, per-batch resident
                      pltpu.VMEM((H, S, D), cd)]   # V

    # Scoped-VMEM budget from the real footprint (double-buffered blocks,
    # scratches, in-kernel temporaries), clamped to v7x's 64 MiB physical VMEM.
    cd_b = jnp.dtype(cd).itemsize
    attn_b = jnp.dtype(attn_dtype).itemsize
    est = (2 * S * D * cd_b                                   # x block
           + 2 * Tq * S * 4                                   # mask block
           + 2 * Tq * D * 4                                   # out block
           + (2 * H * Tq * S * attn_b if return_attn else 0)  # attn block
           + 2 * (3 * H * Din * D + HD * D) * cd_b            # weights
           + 2 * (3 * H * D + D) * 4                          # biases
           + 2 * H * S * D * cd_b                             # K/V scratch
           + 6 * H * Tq * S * 4 + 4 * H * S * D * 4)          # temporaries
    vmem_limit = int(min(64 * 1024 * 1024, max(32 * 1024 * 1024, 2 * est)))

    results = pl.pallas_call(
        kernel,
        out_shape=tuple(out_shape),
        grid_spec=pltpu.PrefetchScalarGridSpec(
            num_scalar_prefetch=0,
            grid=(B, n_q),
            in_specs=in_specs,
            out_specs=out_specs,
            scratch_shapes=scratch_shapes,
        ),
        compiler_params=pltpu.CompilerParams(
            # Query axis must be "arbitrary": the K/V scratch is filled at
            # qi == 0 and reused by the remaining query tiles of each batch.
            dimension_semantics=("parallel", "arbitrary"),
            vmem_limit_bytes=vmem_limit),
    )(x_c, mask_f, wq_h, bq_h, wk_h, bk_h, wv_h, bv_h, wo_c, bo_f)

    if return_attn:
        out, attn = results
    else:
        out = results[0] if isinstance(results, (tuple, list)) else results
        attn = None
    return out, attn


def _reference(x, mask, params, *, H, D):
    """Plain-JAX f32 reference reproducing the PyTorch forward exactly."""
    wq, bq, wk, bk, wv, bv, wo, bo = params
    B, S, _ = x.shape

    def split(t):  # (B, S, H*D) -> (B, H, S, D)
        return t.reshape(B, S, H, D).transpose(0, 2, 1, 3)

    q = split(x @ wq + bq)
    k = split(x @ wk + bk)
    v = split(x @ wv + bv)
    scores = jnp.einsum('bhsd,bhtd->bhst', q, k) / math.sqrt(D)
    scores = scores + mask * (-1000000000.0)
    w = jax.nn.softmax(scores, axis=-1)
    ctx = jnp.einsum('bhst,bhtd->bhsd', w, v)
    concat = ctx.transpose(0, 2, 1, 3).reshape(B, S, H * D)
    return concat @ wo + bo, w


if __name__ == "__main__":
    def make_params(key, D, H):
        DH = D * H
        ks = jax.random.split(key, 8)
        s = 0.02
        return (s * jax.random.normal(ks[0], (D, DH), jnp.float32),
                s * jax.random.normal(ks[1], (1, DH), jnp.float32),
                s * jax.random.normal(ks[2], (D, DH), jnp.float32),
                s * jax.random.normal(ks[3], (1, DH), jnp.float32),
                s * jax.random.normal(ks[4], (D, DH), jnp.float32),
                s * jax.random.normal(ks[5], (1, DH), jnp.float32),
                s * jax.random.normal(ks[6], (DH, D), jnp.float32),
                s * jax.random.normal(ks[7], (1, D), jnp.float32))

    key = jax.random.PRNGKey(0)
    kp, kx1, kx2 = jax.random.split(key, 3)

    # ---- Config 1: single query tile (B=2, S=8, D=32, H=4) -----------------
    B, S, D, H = 2, 8, 32, 4
    params = make_params(kp, D, H)
    x = jax.random.normal(kx1, (B, S, D), jnp.float32)
    causal = jnp.triu(jnp.ones((S, S), jnp.float32), k=1)
    mask = jnp.broadcast_to(causal, (B, 1, S, S))

    out_ref, attn_ref = _reference(x, mask, params, H=H, D=D)
    out, attn = multi_head_attention(x, mask, params, H=H, D=D)
    jax.block_until_ready((out, attn))
    assert float(jnp.max(jnp.abs(out - out_ref))) < 5e-3
    assert float(jnp.max(jnp.abs(attn - attn_ref))) < 5e-3

    # ---- Config 2: multiple query tiles (exercises K/V scratch reuse) ------
    S2 = 16
    x2 = jax.random.normal(kx2, (B, S2, D), jnp.float32)
    causal2 = jnp.triu(jnp.ones((S2, S2), jnp.float32), k=1)
    mask2 = jnp.broadcast_to(causal2, (B, 1, S2, S2))
    out_ref2, attn_ref2 = _reference(x2, mask2, params, H=H, D=D)
    out2, attn2 = multi_head_attention(x2, mask2, params, H=H, D=D, q_block=8)
    jax.block_until_ready((out2, attn2))
    assert float(jnp.max(jnp.abs(out2 - out_ref2))) < 5e-3
    assert float(jnp.max(jnp.abs(attn2 - attn_ref2))) < 5e-3

    # ---- Config 3: perf path, no O(S^2) attention-weights HBM write --------
    out3, attn3 = multi_head_attention(x2, mask2, params, H=H, D=D, q_block=8,
                                       return_attn=False)
    jax.block_until_ready(out3)
    assert attn3 is None
    assert float(jnp.max(jnp.abs(out3 - out_ref2))) < 5e-3

    print("KERNEL_OK")
</pallas_src>

<mosaic_0001>
module attributes {stable_mosaic.version = 11 : i64} {
  func.func @kernel(%arg0: i32, %arg1: i32, %arg2: memref<1x8x32xbf16, #tpu.memory_space<vmem>>, %arg3: memref<1x1x8x8xf32, #tpu.memory_space<vmem>>, %arg4: memref<4x32x32xbf16, #tpu.memory_space<vmem>>, %arg5: memref<4x1x32xf32, #tpu.memory_space<vmem>>, %arg6: memref<4x32x32xbf16, #tpu.memory_space<vmem>>, %arg7: memref<4x1x32xf32, #tpu.memory_space<vmem>>, %arg8: memref<4x32x32xbf16, #tpu.memory_space<vmem>>, %arg9: memref<4x1x32xf32, #tpu.memory_space<vmem>>, %arg10: memref<128x32xbf16, #tpu.memory_space<vmem>>, %arg11: memref<1x32xf32, #tpu.memory_space<vmem>>, %arg12: memref<1x8x32xf32, #tpu.memory_space<vmem>>, %arg13: memref<1x4x8x8xf32, #tpu.memory_space<vmem>>, %arg14: memref<4x8x32xbf16, #tpu.memory_space<vmem>>, %arg15: memref<4x8x32xbf16, #tpu.memory_space<vmem>>) attributes {dimension_semantics = [#tpu.dimension_semantics<parallel>, #tpu.dimension_semantics<arbitrary>], iteration_bounds = array<i64: 2, 1>, scalar_prefetch = 0 : i64, scratch_operands = 2 : i64, tpu.core_type = #tpu.core_type<tc>, window_params = [{transform_indices = @transform_0, window_bounds = array<i64: 1, 8, 32>}, {transform_indices = @transform_1, window_bounds = array<i64: 1, 1, 8, 8>}, {pipeline_mode = #tpu.pipeline_mode<synchronous>, transform_indices = @transform_2, window_bounds = array<i64: 4, 32, 32>}, {pipeline_mode = #tpu.pipeline_mode<synchronous>, transform_indices = @transform_3, window_bounds = array<i64: 4, 1, 32>}, {pipeline_mode = #tpu.pipeline_mode<synchronous>, transform_indices = @transform_4, window_bounds = array<i64: 4, 32, 32>}, {pipeline_mode = #tpu.pipeline_mode<synchronous>, transform_indices = @transform_5, window_bounds = array<i64: 4, 1, 32>}, {pipeline_mode = #tpu.pipeline_mode<synchronous>, transform_indices = @transform_6, window_bounds = array<i64: 4, 32, 32>}, {pipeline_mode = #tpu.pipeline_mode<synchronous>, transform_indices = @transform_7, window_bounds = array<i64: 4, 1, 32>}, {pipeline_mode = #tpu.pipeline_mode<synchronous>, transform_indices = @transform_8, window_bounds = array<i64: 128, 32>}, {pipeline_mode = #tpu.pipeline_mode<synchronous>, transform_indices = @transform_9, window_bounds = array<i64: 1, 32>}, {transform_indices = @transform_10, window_bounds = array<i64: 1, 8, 32>}, {transform_indices = @transform_11, window_bounds = array<i64: 1, 4, 8, 8>}]} {
    %c0_i32 = arith.constant 0 : i32
    %0 = arith.cmpi eq, %arg1, %c0_i32 : i32
    %1 = arith.extui %0 : i1 to i32
    %c0_i32_0 = arith.constant 0 : i32
    %2 = arith.cmpi ne, %1, %c0_i32_0 : i32
    scf.if %2 {
      %c0_36 = arith.constant 0 : index
      %c0_37 = arith.constant 0 : index
      %c0_38 = arith.constant 0 : index
      %64 = vector.load %arg2[%c0_36, %c0_37, %c0_38] : memref<1x8x32xbf16, #tpu.memory_space<vmem>>, vector<1x8x32xbf16>
      %65 = vector.shape_cast %64 : vector<1x8x32xbf16> to vector<8x32xbf16>
      %66 = vector.shape_cast %65 : vector<8x32xbf16> to vector<1x8x32xbf16>
      %67 = vector.shape_cast %66 : vector<1x8x32xbf16> to vector<1x8x32xbf16>
      %68 = vector.broadcast %67 : vector<1x8x32xbf16> to vector<4x8x32xbf16>
      %c0_39 = arith.constant 0 : index
      %c0_40 = arith.constant 0 : index
      %c0_41 = arith.constant 0 : index
      %69 = vector.load %arg6[%c0_39, %c0_40, %c0_41] : memref<4x32x32xbf16, #tpu.memory_space<vmem>>, vector<4x32x32xbf16>
      "tpu.trace_start"() <{level = 10 : i32, message = "hsd,hde->hse"}> : () -> ()
      %cst_42 = arith.constant dense<0.000000e+00> : vector<4x8x32xf32>
      %70 = tpu.matmul %68, %69, %cst_42 {dimension_numbers = #tpu.dot_dimension_numbers<[2], [1], [1], [2], [0, 0, 0, 1, 1, 2], [0], [0]>} : vector<4x8x32xbf16>, vector<4x32x32xbf16>, vector<4x8x32xf32> -> vector<4x8x32xf32>
      "tpu.trace_stop"() : () -> ()
      %c0_43 = arith.constant 0 : index
      %c0_44 = arith.constant 0 : index
      %c0_45 = arith.constant 0 : index
      %71 = vector.load %arg7[%c0_43, %c0_44, %c0_45] : memref<4x1x32xf32, #tpu.memory_space<vmem>>, vector<4x1x32xf32>
      %72 = vector.broadcast %71 : vector<4x1x32xf32> to vector<4x8x32xf32>
      %73 = arith.addf %70, %72 : vector<4x8x32xf32>
      %c0_46 = arith.constant 0 : index
      %c0_47 = arith.constant 0 : index
      %c0_48 = arith.constant 0 : index
      %74 = vector.load %arg8[%c0_46, %c0_47, %c0_48] : memref<4x32x32xbf16, #tpu.memory_space<vmem>>, vector<4x32x32xbf16>
      "tpu.trace_start"() <{level = 10 : i32, message = "hsd,hde->hse"}> : () -> ()
      %cst_49 = arith.constant dense<0.000000e+00> : vector<4x8x32xf32>
      %75 = tpu.matmul %68, %74, %cst_49 {dimension_numbers = #tpu.dot_dimension_numbers<[2], [1], [1], [2], [0, 0, 0, 1, 1, 2], [0], [0]>} : vector<4x8x32xbf16>, vector<4x32x32xbf16>, vector<4x8x32xf32> -> vector<4x8x32xf32>
      "tpu.trace_stop"() : () -> ()
      %c0_50 = arith.constant 0 : index
      %c0_51 = arith.constant 0 : index
      %c0_52 = arith.constant 0 : index
      %76 = vector.load %arg9[%c0_50, %c0_51, %c0_52] : memref<4x1x32xf32, #tpu.memory_space<vmem>>, vector<4x1x32xf32>
      %77 = vector.broadcast %76 : vector<4x1x32xf32> to vector<4x8x32xf32>
      %78 = arith.addf %75, %77 : vector<4x8x32xf32>
      %79 = arith.truncf %73 : vector<4x8x32xf32> to vector<4x8x32xbf16>
      %c0_53 = arith.constant 0 : index
      %c0_54 = arith.constant 0 : index
      %c0_55 = arith.constant 0 : index
      %80 = vector.load %arg14[%c0_53, %c0_54, %c0_55] : memref<4x8x32xbf16, #tpu.memory_space<vmem>>, vector<4x8x32xbf16>
      tpu.vector_store %arg14[%c0_53, %c0_54, %c0_55], %79 {strides = array<i32>} : memref<4x8x32xbf16, #tpu.memory_space<vmem>>, vector<4x8x32xbf16>,
      %81 = arith.truncf %78 : vector<4x8x32xf32> to vector<4x8x32xbf16>
      %c0_56 = arith.constant 0 : index
      %c0_57 = arith.constant 0 : index
      %c0_58 = arith.constant 0 : index
      %82 = vector.load %arg15[%c0_56, %c0_57, %c0_58] : memref<4x8x32xbf16, #tpu.memory_space<vmem>>, vector<4x8x32xbf16>
      tpu.vector_store %arg15[%c0_56, %c0_57, %c0_58], %81 {strides = array<i32>} : memref<4x8x32xbf16, #tpu.memory_space<vmem>>, vector<4x8x32xbf16>,
    } else {
    }
    %c8_i32 = arith.constant 8 : i32
    %3 = arith.muli %arg1, %c8_i32 : i32
    %4 = tpu.assume_multiple %3, 8 : i32
    %c0 = arith.constant 0 : index
    %5 = arith.index_cast %4 : i32 to index
    %c0_1 = arith.constant 0 : index
    %6 = vector.load %arg2[%c0, %5, %c0_1] : memref<1x8x32xbf16, #tpu.memory_space<vmem>>, vector<1x8x32xbf16>
    %7 = vector.shape_cast %6 : vector<1x8x32xbf16> to vector<8x32xbf16>
    %8 = vector.shape_cast %7 : vector<8x32xbf16> to vector<1x8x32xbf16>
    %9 = vector.shape_cast %8 : vector<1x8x32xbf16> to vector<1x8x32xbf16>
    %10 = vector.broadcast %9 : vector<1x8x32xbf16> to vector<4x8x32xbf16>
    %c0_2 = arith.constant 0 : index
    %c0_3 = arith.constant 0 : index
    %c0_4 = arith.constant 0 : index
    %11 = vector.load %arg4[%c0_2, %c0_3, %c0_4] : memref<4x32x32xbf16, #tpu.memory_space<vmem>>, vector<4x32x32xbf16>
    "tpu.trace_start"() <{level = 10 : i32, message = "htd,hde->hte"}> : () -> ()
    %cst = arith.constant dense<0.000000e+00> : vector<4x8x32xf32>
    %12 = tpu.matmul %10, %11, %cst {dimension_numbers = #tpu.dot_dimension_numbers<[2], [1], [1], [2], [0, 0, 0, 1, 1, 2], [0], [0]>} : vector<4x8x32xbf16>, vector<4x32x32xbf16>, vector<4x8x32xf32> -> vector<4x8x32xf32>
    "tpu.trace_stop"() : () -> ()
    %c0_5 = arith.constant 0 : index
    %c0_6 = arith.constant 0 : index
    %c0_7 = arith.constant 0 : index
    %13 = vector.load %arg5[%c0_5, %c0_6, %c0_7] : memref<4x1x32xf32, #tpu.memory_space<vmem>>, vector<4x1x32xf32>
    %14 = vector.broadcast %13 : vector<4x1x32xf32> to vector<4x8x32xf32>
    %15 = arith.addf %12, %14 : vector<4x8x32xf32>
    %16 = arith.truncf %15 : vector<4x8x32xf32> to vector<4x8x32xbf16>
    %c0_8 = arith.constant 0 : index
    %c0_9 = arith.constant 0 : index
    %c0_10 = arith.constant 0 : index
    %c0_11 = arith.constant 0 : index
    %17 = vector.load %arg3[%c0_8, %c0_9, %c0_10, %c0_11] : memref<1x1x8x8xf32, #tpu.memory_space<vmem>>, vector<1x1x8x8xf32>
    %18 = vector.shape_cast %17 : vector<1x1x8x8xf32> to vector<8x8xf32>
    %cst_12 = arith.constant -1.000000e+09 : f32
    %19 = vector.broadcast %cst_12 : f32 to vector<8x8xf32>
    %20 = arith.mulf %18, %19 : vector<8x8xf32>
    %c0_13 = arith.constant 0 : index
    %c0_14 = arith.constant 0 : index
    %c0_15 = arith.constant 0 : index
    %21 = vector.load %arg14[%c0_13, %c0_14, %c0_15] : memref<4x8x32xbf16, #tpu.memory_space<vmem>>, vector<4x8x32xbf16>
    "tpu.trace_start"() <{level = 10 : i32, message = "hqd,hkd->hqk"}> : () -> ()
    %cst_16 = arith.constant dense<0.000000e+00> : vector<4x8x8xf32>
    %22 = tpu.matmul %16, %21, %cst_16 {dimension_numbers = #tpu.dot_dimension_numbers<[2], [2], [1], [1], [0, 0, 0, 1, 1, 1], [0], [0]>} : vector<4x8x32xbf16>, vector<4x8x32xbf16>, vector<4x8x8xf32> -> vector<4x8x8xf32>
    "tpu.trace_stop"() : () -> ()
    %cst_17 = arith.constant 0.176776692 : f32
    %23 = vector.broadcast %cst_17 : f32 to vector<4x8x8xf32>
    %24 = arith.mulf %22, %23 : vector<4x8x8xf32>
    %25 = vector.shape_cast %20 : vector<8x8xf32> to vector<1x8x8xf32>
    %26 = vector.broadcast %25 : vector<1x8x8xf32> to vector<4x8x8xf32>
    %27 = arith.addf %24, %26 : vector<4x8x8xf32>
    %cst_18 = arith.constant dense<0xFF800000> : vector<4x8xf32>
    %28 = vector.multi_reduction <maximumf>, %27, %cst_18 [2] : vector<4x8x8xf32> to vector<4x8xf32>
    %29 = vector.shape_cast %28 : vector<4x8xf32> to vector<4x8x1xf32>
    %30 = vector.broadcast %29 : vector<4x8x1xf32> to vector<4x8x8xf32>
    %31 = arith.subf %27, %30 : vector<4x8x8xf32>
    %32 = math.exp %31 : vector<4x8x8xf32>
    %cst_19 = arith.constant dense<0.000000e+00> : vector<4x8xf32>
    %33 = vector.multi_reduction <add>, %32, %cst_19 [2] : vector<4x8x8xf32> to vector<4x8xf32>
    %34 = vector.shape_cast %33 : vector<4x8xf32> to vector<4x8x1xf32>
    %35 = vector.broadcast %34 : vector<4x8x1xf32> to vector<4x8x8xf32>
    %36 = arith.divf %32, %35 : vector<4x8x8xf32>
    %c0_20 = arith.constant 0 : index
    %c0_21 = arith.constant 0 : index
    %c0_22 = arith.constant 0 : index
    %c0_23 = arith.constant 0 : index
    %37 = vector.load %arg13[%c0_20, %c0_21, %c0_22, %c0_23] : memref<1x4x8x8xf32, #tpu.memory_space<vmem>>, vector<1x4x8x8xf32>
    %38 = vector.shape_cast %37 : vector<1x4x8x8xf32> to vector<4x8x8xf32>
    %39 = vector.shape_cast %36 : vector<4x8x8xf32> to vector<1x4x8x8xf32>
    tpu.vector_store %arg13[%c0_20, %c0_21, %c0_22, %c0_23], %39 {strides = array<i32>} : memref<1x4x8x8xf32, #tpu.memory_space<vmem>>, vector<1x4x8x8xf32>,
    %40 = arith.truncf %36 : vector<4x8x8xf32> to vector<4x8x8xbf16>
    %c0_24 = arith.constant 0 : index
    %c0_25 = arith.constant 0 : index
    %c0_26 = arith.constant 0 : index
    %41 = vector.load %arg15[%c0_24, %c0_25, %c0_26] : memref<4x8x32xbf16, #tpu.memory_space<vmem>>, vector<4x8x32xbf16>
    "tpu.trace_start"() <{level = 10 : i32, message = "hqk,hkd->hqd"}> : () -> ()
    %cst_27 = arith.constant dense<0.000000e+00> : vector<4x8x32xf32>
    %42 = tpu.matmul %40, %41, %cst_27 {dimension_numbers = #tpu.dot_dimension_numbers<[2], [1], [1], [2], [0, 0, 0, 1, 1, 2], [0], [0]>} : vector<4x8x8xbf16>, vector<4x8x32xbf16>, vector<4x8x32xf32> -> vector<4x8x32xf32>
    "tpu.trace_stop"() : () -> ()
    %43 = vector.extract_strided_slice %42 {offsets = [0, 0, 0], sizes = [1, 8, 32], strides = [1, 1, 1]} : vector<4x8x32xf32> to vector<1x8x32xf32>
    %44 = vector.shape_cast %43 : vector<1x8x32xf32> to vector<8x32xf32>
    %45 = arith.truncf %44 : vector<8x32xf32> to vector<8x32xbf16>
    %46 = vector.extract_strided_slice %42 {offsets = [1, 0, 0], sizes = [1, 8, 32], strides = [1, 1, 1]} : vector<4x8x32xf32> to vector<1x8x32xf32>
    %47 = vector.shape_cast %46 : vector<1x8x32xf32> to vector<8x32xf32>
    %48 = arith.truncf %47 : vector<8x32xf32> to vector<8x32xbf16>
    %49 = vector.extract_strided_slice %42 {offsets = [2, 0, 0], sizes = [1, 8, 32], strides = [1, 1, 1]} : vector<4x8x32xf32> to vector<1x8x32xf32>
    %50 = vector.shape_cast %49 : vector<1x8x32xf32> to vector<8x32xf32>
    %51 = arith.truncf %50 : vector<8x32xf32> to vector<8x32xbf16>
    %52 = vector.extract_strided_slice %42 {offsets = [3, 0, 0], sizes = [1, 8, 32], strides = [1, 1, 1]} : vector<4x8x32xf32> to vector<1x8x32xf32>
    %53 = vector.shape_cast %52 : vector<1x8x32xf32> to vector<8x32xf32>
    %54 = arith.truncf %53 : vector<8x32xf32> to vector<8x32xbf16>
    %55 = tpu.concatenate %45, %48, %51, %54 in 1 : vector<8x32xbf16>, vector<8x32xbf16>, vector<8x32xbf16>, vector<8x32xbf16> -> vector<8x128xbf16>
    %c0_28 = arith.constant 0 : index
    %c0_29 = arith.constant 0 : index
    %56 = vector.load %arg10[%c0_28, %c0_29] : memref<128x32xbf16, #tpu.memory_space<vmem>>, vector<128x32xbf16>
    %cst_30 = arith.constant dense<0.000000e+00> : vector<8x32xf32>
    %57 = tpu.matmul %55, %56, %cst_30 {dimension_numbers = #tpu.dot_dimension_numbers<[1], [0], [0], [1], [0, 0, 1, 1], [], []>} : vector<8x128xbf16>, vector<128x32xbf16>, vector<8x32xf32> -> vector<8x32xf32>
    %c0_31 = arith.constant 0 : index
    %c0_32 = arith.constant 0 : index
    %58 = vector.load %arg11[%c0_31, %c0_32] : memref<1x32xf32, #tpu.memory_space<vmem>>, vector<1x32xf32>
    %59 = vector.broadcast %58 : vector<1x32xf32> to vector<8x32xf32>
    %60 = arith.addf %57, %59 : vector<8x32xf32>
    %c0_33 = arith.constant 0 : index
    %c0_34 = arith.constant 0 : index
    %c0_35 = arith.constant 0 : index
    %61 = vector.load %arg12[%c0_33, %c0_34, %c0_35] : memref<1x8x32xf32, #tpu.memory_space<vmem>>, vector<1x8x32xf32>
    %62 = vector.shape_cast %61 : vector<1x8x32xf32> to vector<8x32xf32>
    %63 = vector.shape_cast %60 : vector<8x32xf32> to vector<1x8x32xf32>
    tpu.vector_store %arg12[%c0_33, %c0_34, %c0_35], %63 {strides = array<i32>} : memref<1x8x32xf32, #tpu.memory_space<vmem>>, vector<1x8x32xf32>,
    return
  }
  func.func @transform_0(%arg0: i32, %arg1: i32) -> (i32, i32, i32) {
    %c0_i32 = arith.constant 0 : i32
    %c0_i32_0 = arith.constant 0 : i32
    %c0_i32_1 = arith.constant 0 : i32
    return %arg0, %c0_i32, %c0_i32_0 : i32, i32, i32
  }
  func.func @transform_1(%arg0: i32, %arg1: i32) -> (i32, i32, i32, i32) {
    %c0_i32 = arith.constant 0 : i32
    %c0_i32_0 = arith.constant 0 : i32
    %c0_i32_1 = arith.constant 0 : i32
    return %arg0, %c0_i32, %arg1, %c0_i32_0 : i32, i32, i32, i32
  }
  func.func @transform_2(%arg0: i32, %arg1: i32) -> (i32, i32, i32) {
    %c0_i32 = arith.constant 0 : i32
    %c0_i32_0 = arith.constant 0 : i32
    %c0_i32_1 = arith.constant 0 : i32
    %c0_i32_2 = arith.constant 0 : i32
    return %c0_i32, %c0_i32_0, %c0_i32_1 : i32, i32, i32
  }
  func.func @transform_3(%arg0: i32, %arg1: i32) -> (i32, i32, i32) {
    %c0_i32 = arith.constant 0 : i32
    %c0_i32_0 = arith.constant 0 : i32
    %c0_i32_1 = arith.constant 0 : i32
    %c0_i32_2 = arith.constant 0 : i32
    return %c0_i32, %c0_i32_0, %c0_i32_1 : i32, i32, i32
  }
  func.func @transform_4(%arg0: i32, %arg1: i32) -> (i32, i32, i32) {
    %c0_i32 = arith.constant 0 : i32
    %c0_i32_0 = arith.constant 0 : i32
    %c0_i32_1 = arith.constant 0 : i32
    %c0_i32_2 = arith.constant 0 : i32
    return %c0_i32, %c0_i32_0, %c0_i32_1 : i32, i32, i32
  }
  func.func @transform_5(%arg0: i32, %arg1: i32) -> (i32, i32, i32) {
    %c0_i32 = arith.constant 0 : i32
    %c0_i32_0 = arith.constant 0 : i32
    %c0_i32_1 = arith.constant 0 : i32
    %c0_i32_2 = arith.constant 0 : i32
    return %c0_i32, %c0_i32_0, %c0_i32_1 : i32, i32, i32
  }
  func.func @transform_6(%arg0: i32, %arg1: i32) -> (i32, i32, i32) {
    %c0_i32 = arith.constant 0 : i32
    %c0_i32_0 = arith.constant 0 : i32
    %c0_i32_1 = arith.constant 0 : i32
    %c0_i32_2 = arith.constant 0 : i32
    return %c0_i32, %c0_i32_0, %c0_i32_1 : i32, i32, i32
  }
  func.func @transform_7(%arg0: i32, %arg1: i32) -> (i32, i32, i32) {
    %c0_i32 = arith.constant 0 : i32
    %c0_i32_0 = arith.constant 0 : i32
    %c0_i32_1 = arith.constant 0 : i32
    %c0_i32_2 = arith.constant 0 : i32
    return %c0_i32, %c0_i32_0, %c0_i32_1 : i32, i32, i32
  }
  func.func @transform_8(%arg0: i32, %arg1: i32) -> (i32, i32) {
    %c0_i32 = arith.constant 0 : i32
    %c0_i32_0 = arith.constant 0 : i32
    %c0_i32_1 = arith.constant 0 : i32
    return %c0_i32, %c0_i32_0 : i32, i32
  }
  func.func @transform_9(%arg0: i32, %arg1: i32) -> (i32, i32) {
    %c0_i32 = arith.constant 0 : i32
    %c0_i32_0 = arith.constant 0 : i32
    %c0_i32_1 = arith.constant 0 : i32
    return %c0_i32, %c0_i32_0 : i32, i32
  }
  func.func @transform_10(%arg0: i32, %arg1: i32) -> (i32, i32, i32) {
    %c0_i32 = arith.constant 0 : i32
    %c0_i32_0 = arith.constant 0 : i32
    return %arg0, %arg1, %c0_i32 : i32, i32, i32
  }
  func.func @transform_11(%arg0: i32, %arg1: i32) -> (i32, i32, i32, i32) {
    %c0_i32 = arith.constant 0 : i32
    %c0_i32_0 = arith.constant 0 : i32
    %c0_i32_1 = arith.constant 0 : i32
    return %arg0, %c0_i32, %arg1, %c0_i32_0 : i32, i32, i32, i32
  }
}

</mosaic_0001>

<bundles_post_ra>
// kernel: tpu_custom_call.1
= control target key start
LH: loop header
LB: loop body
LE: loop exit
PB: predicated region body
PF: predicated region fallthrough
CT: control target
= control target key end

     0   :  { %s2578_s0 = inlined_call_operand.hbm [shape: bf16[2,8,32], index: 0, kind: input, shape index: {}]   ;;  %s2579_s1 = inlined_call_operand.vmem [shape: f32[2,1,8,8], index: 1, kind: input, shape index: {}]   ;;  %s2580_s2 = inlined_call_operand.vmem [shape: bf16[4,32,32], index: 2, kind: input, shape index: {}]   ;;  %s2581_s3 = inlined_call_operand.hbm [shape: f32[4,1,32], index: 3, kind: input, shape index: {}]   ;;  %s2582_s4 = inlined_call_operand.hbm [shape: bf16[4,32,32], index: 4, kind: input, shape index: {}]   ;;  %s2583_s5 = inlined_call_operand.vmem [shape: f32[4,1,32], index: 5, kind: input, shape index: {}]   ;;  %s2584_s6 = inlined_call_operand.hbm [shape: bf16[4,32,32], index: 6, kind: input, shape index: {}]   ;;  %s2585_s7 = inlined_call_operand.hbm [shape: f32[4,1,32], index: 7, kind: input, shape index: {}]   ;;  %s2586_s8 = inlined_call_operand.vmem [shape: bf16[128,32], index: 8, kind: input, shape index: {}]   ;;  %s2587_s9 = inlined_call_operand.vmem [shape: f32[1,32], index: 9, kind: input, shape index: {}]   ;;  %s2588_s10 = inlined_call_operand.hbm [shape: f32[2,8,32], index: 10, kind: output, shape index: {0}]   ;;  %s2589_s11 = inlined_call_operand.hbm [shape: f32[2,4,8,8], index: 11, kind: output, shape index: {1}]  }
   0x1   :  { %2592 = sst [smem:[#allocation21_spill]] %s2578_s0 }
   0x2   :  { %2593 = sst [smem:[#allocation22_spill]] %s2579_s1 }
   0x3   :  { %2594 = sst [smem:[#allocation23_spill]] %s2580_s2 }
   0x4   :  { %2595 = sst [smem:[#allocation24_spill]] %s2581_s3 }
   0x5   :  { %2596 = sst [smem:[#allocation25_spill]] %s2582_s4 }
   0x6   :  { %2597 = sst [smem:[#allocation26_spill]] %s2584_s6 }
   0x7   :  { %2598 = sst [smem:[#allocation27_spill]] %s2585_s7 }
   0x8   :  { %2599 = sst [smem:[#allocation28_spill]] %s2587_s9 }
   0x9   :  { %2600 = sst [smem:[#allocation29_spill]] %s2588_s10 }
   0xa   :  { %17 = vsyncpa [#allocation5], 0 }
   0xb   :  { %19 = vsyncpa [#allocation5 + $0x1], 0 }
   0xc   :  { %20 = vsyncpa [#allocation8], 0 }
   0xd   :  { %21 = vsyncpa [#allocation11], 0 }
   0xe   :  { %22 = vsyncpa [#allocation6], 0 }
   0xf   :  { %24 = vsyncpa [#allocation6 + $0x1], 0 }
  0x10   :  { %25 = vsyncpa [#allocation15], 0 }
  0x11   :  { %27 = vsyncpa [#allocation15 + $0x1], 0  ;;  %s2258_s17 = smov 0   ;;  %s2260_s18 = smov 0  }
  0x12   :  { %s2262_s19 = smov 0   ;;  %s2264_s20 = smov 0  }
  0x13   :  { %s2266_s21 = smov 0   ;;  %s2268_s22 = smov 0  }
  0x14 LB: > { %s2590_s23 = sadd.s32 4294967295, %s2183_s22   ;;  %p1560_p0 = scmp.ge.s32.totalorder %s2183_s22, 1  ;;  %s2183_s22 = sphi %s2268_s22, %s33_s22   ;;  %s2179_s21 = sphi %s2266_s21, %s2621_s21   ;;  %s2175_s20 = sphi %s2264_s20, %s2620_s20   ;;  %s2171_s19 = sphi %s2262_s19, %s2619_s19   ;;  %s2167_s18 = sphi %s2260_s18, %s2618_s18   ;;  %s2163_s17 = sphi %s2258_s17, %s2617_s17  }
  0x15   : > { %p2292_p1 = scmp.eq.s32.totalorder %s2590_s23, 0  ;;  %p328_p2 = scmp.lt.s32.totalorder %s2183_s22, 3 }
  0x16   : > { %s2602_s3 = sld [smem:[#allocation24_spill]]  ;;  %s2185_s29 = smov [#allocation7]  }
  0x17   : > { %p2300_p3 = pnand %p1560_p0, %p328_p2  ;;  %s344_s30 = sshll.u32 %s2185_s29, 4  ;;  %s345_s30 = int_to_ptr.vmem [resolvable:$true] %s344_s30 }
  0x18   : > { %p1565_p6 = scmp.ge.s32.totalorder %s2183_s22, 2  ;;  %s2605_s6 = sld [smem:[#allocation26_spill]] }
  0x19   : > { %p1787_p4 = pneg %p2300_p3  ;;  %s2186_s16 = smov 16  }
  0x1a   : > { %s2187_s25 = smov 1   ;;  %s2188_s26 = smov [#allocation10]  }
  0x1b   : > { %p2308_p5 = pnand %p1787_p4, %p2292_p1  ;;  %s375_s29 = sshll.u32 %s2188_s26, 4  ;;  %s376_s29 = int_to_ptr.vmem [resolvable:$true] %s375_s29 }
  0x1c   : > { %s342_s27 = sshll.u32 %s2602_s3, 4  ;;  %s2606_s4 = sld [smem:[#allocation25_spill]]  ;;  %s343_s27 = int_to_ptr.hbm [resolvable:$true] %s342_s27 }
  0x1d   : > { %1790 = dma.hbm_to_vmem [thread:$0]  (!%p2308_p5), %s343_s27, 64, %s345_s30, [#allocation8], %s2186_s16, %s2186_s16, %s2187_s25  }
  0x1e   : > { %s373_s15 = sshll.u32 %s2605_s6, 4  ;;  %s2189_s10 = smov 64   ;;  %s374_s15 = int_to_ptr.hbm [resolvable:$true] %s373_s15 }
  0x1f   : > { %s2190_s13 = smov 4   ;;  %s2607_s7 = sld [smem:[#allocation27_spill]] }
  0x20   : > { %1796 = dma.hbm_to_vmem [thread:$0]  (!%p2308_p5), %s374_s15, 1024, %s376_s29, [#allocation11], %s2189_s10, %s2189_s10, %s2190_s13  }
  0x21   : > { %s2191_s26 = smov [#allocation9]   ;;  %s2192_s23 = smov [#allocation12]  }
  0x22   : > { %s356_s9 = sshll.u32 %s2606_s4, 4  ;;  %s358_s3 = sshll.u32 %s2191_s26, 4  ;;  %s357_s9 = int_to_ptr.hbm [resolvable:$true] %s356_s9  ;;  %s359_s3 = int_to_ptr.vmem [resolvable:$true] %s358_s3 }
  0x23   : > { %1793 = dma.hbm_to_vmem [thread:$0]  (!%p2308_p5), %s357_s9, 1024, %s359_s3, [#allocation8], %s2189_s10, %s2189_s10, %s2190_s13  }
  0x24   : > { %s389_s4 = sshll.u32 %s2192_s23, 4  ;;  %s45_s15 = sadd.s32 1, %s2179_s21  ;;  %s390_s4 = int_to_ptr.vmem [resolvable:$true] %s389_s4 }
  0x25   : > { %s387_s14 = sshll.u32 %s2607_s7, 4  ;;  %s1559_s29 = sadd.s32 4294967294, %s2183_s22   ;;  %s388_s14 = int_to_ptr.hbm [resolvable:$true] %s387_s14 }
  0x26   : > { %1799 = dma.hbm_to_vmem [thread:$0]  (!%p2308_p5), %s388_s14, 64, %s390_s4, [#allocation11], %s2186_s16, %s2186_s16, %s2187_s25  }
  0x27   : > { %p47_p7 = scmp.ge.s32.totalorder %s45_s15, 2  ;;  %s52_s27 = sadd.s32 1, %s2171_s19 }
  0x28   : > { %p59_p8 = scmp.ne.s32.totalorder %s2171_s19, %s2167_s18  ;;  %p60_p9 = scmp.eq.s32.totalorder %s2183_s22, 0 }
  0x29   : > { %s2623_s15 = smov (%p47_p7, %s45_s15), 0  ;;  %p65_p10 = scmp.ne.s32.totalorder %s2167_s18, %s2163_s17 }
  0x2a   : > { %s49_s9 = ssub.s32 %s2179_s21, %s2623_s15  ;;  %s2608_s10 = sadd.s32 4294967295, %s2183_s22  }
  0x2b   : > { %p287_p11 = scmp.eq.s32.totalorder %s2608_s10, 1  ;;  %p50_p12 = scmp.eq.s32.totalorder %s49_s9, 0 }
  0x2c   : > { %p2346_p13 = por %p2292_p1, %p65_p10  ;;  %p293_p2 = scmp.eq.s32.totalorder %s1559_s29, 1 }
  0x2d   : > { %p2350_p0 = por %p287_p11, %p59_p8  ;;  %p61_p4 = por %p60_p9, %p59_p8 }
  0x2e   : > { %s2355_s16 = scalar_select %p50_p12, %s2171_s19, %s52_s27  }
  0x2f   : > { %p2357_p5 = por %p293_p2, %p65_p10  ;;  %s409_s13 = sand.u32 1, %s2171_s19  }
  0x30   : > { %s1567_s30 = sshll.u32 %s2179_s21, 2  ;;  %p1815_p7 = scmp.lt.s32.totalorder %s2183_s22, 2 }
  0x31   : > { %s1566_s14 = sshll.u32 %s409_s13, 2  ;;  %s2612_s0 = sld [smem:[#allocation21_spill]] }
  0x32   : > { %s413_s10 = scalar_lea.vmem [#allocation4], %s1566_s14  ;;  %p1801_p11 = pnand %p1815_p7, %p61_p4 }
  0x33   : > { %s421_s6 = sshll.u32 %s413_s10, 4  ;;  %s410_s29 = scalar_lea.sflag [#allocation5], %s409_s13  ;;  %s422_s6 = int_to_ptr.vmem [resolvable:$true] %s421_s6 }
  0x34   : > { %s2370_s27 = sand.u32 (!%p2300_p3), 1, %s2167_s18  }
  0x35   : > { %440 = sbr.rel (%p2300_p3) target bundleno = 1040 (0x410), region = 60  ;;  %s1569_s7 = sshll.u32 (!%p2300_p3), %s2370_s27, 2 }
  0x36   : > { %s443_s26 = scalar_lea.sflag (!%p2300_p3), [#allocation5], %s2370_s27 }
  0x37   : > { %s417_s23 = scalar_lea.hbm %s2612_s0, %s1567_s30  ;;  %s2374_s30 = scalar_lea.vmem (!%p2300_p3), [#allocation4], %s1569_s7 }
  0x38   : > { %s419_s9 = sshll.u32 %s417_s23, 4  ;;  %s420_s9 = int_to_ptr.hbm [resolvable:$true] %s419_s9 }
  0x39   : > { %1803 = dma.hbm_to_vmem [thread:$0]  (!%p1801_p11), %s420_s9, 64, %s422_s6, %s410_s29  }
  0x3a   : > { %2142 = dma.done.wait (%p2346_p13), %s443_s26, 64  }
  0x3b   : > { %2144 = vsyncadd (%p2346_p13), %s443_s26, 4294967232 }
  0x3c   : > { %2146 = dma.done.wait (%p2292_p1), [#allocation8], 1088  }
  0x3d   : > { %2148 = vsyncadd (%p2292_p1), [#allocation8], 4294966208 }
  0x3e   : > { %2150 = dma.done.wait (%p2292_p1), [#allocation11], 1088  }
  0x3f   : > { %2152 = vsyncadd (%p2292_p1), [#allocation11], 4294966208  ;;  %v1733_v0 = vld [vmem:[#allocation9 + $0x8] sm:$0xff]  ;;  %v1739_v2 = vld [vmem:[#allocation9 + $0x38] sm:$0xff]  ;;  %vm575_vm0 = vcmask 261120   ;;  %s2613_s2 = sld [smem:[#allocation23_spill]] }
  0x40   : > { %v1737_v1 = vld [vmem:[#allocation9 + $0x28] sm:$0xff]  ;;  %585 = vmatpush.bf16.msra.mxu1 %v1733_v0  ;;  %v1732_v3 = vld [vmem:[#allocation9] sm:$0xff]  ;;  %660 = vmatpush.bf16.msra.mxu3 %v1739_v2  ;;  %v1738_v5 = vld [vmem:[#allocation9 + $0x30] sm:$0xff]  ;;  %vm803_vm1 = vcmask 257024   ;;  %vm1164_vm2 = vcmask 1043456   ;;  %p518_p1 = scmp.lt.s32.totalorder %s2175_s20, 1 }
  0x41   : > { %635 = vmatpush.bf16.msra.mxu2 %v1737_v1  ;;  %v1736_v4 = vld [vmem:[#allocation9 + $0x20] sm:$0xff]  ;;  %v1745_v6 = vld [vmem:[#allocation10 + $0x28] sm:$0xff]  ;;  %v1747_v7 = vld [vmem:[#allocation10 + $0x38] sm:$0xff]  ;;  %s2614_s1 = sld [smem:[#allocation22_spill]]  ;;  %vm1052_vm3 = vcmask 64512   ;;  %s1575_s24 = sshll.u32 %s2370_s27, 5 }
  0x42   : > { %v1735_v8 = vld [vmem:[#allocation9 + $0x18] sm:$0xff]  ;;  %v1744_v10 = vld [vmem:[#allocation10 + $0x20] sm:$0xff]  ;;  %v1734_v11 = vld [vmem:[#allocation9 + $0x10] sm:$0xff]  ;;  %s519_s10 = scalar_select %p518_p1, %s2175_s20, 1 }
  0x43   : > { %v530_v9 = vld [vmem:[%s2374_s30] sm:$0xf]  ;;  %v1741_v15 = vld [vmem:[#allocation10 + $0x8] sm:$0xff]  ;;  %v1740_v17 = vld [vmem:[#allocation10] sm:$0xff]  ;;  %s2478_s28 = scalar_lea.vmem [#allocation14], %s1575_s24  ;;  %s2193_s4 = smov 32  }
  0x44   : > { %586 = vmatpush.bf16.msra.mxu1 %v1732_v3  ;;  %v1746_v12 = vld [vmem:[#allocation10 + $0x30] sm:$0xff]  ;;  %661 = vmatpush.bf16.msra.mxu3 %v1738_v5  ;;  %v1743_v16 = vld [vmem:[#allocation10 + $0x18] sm:$0xff]  ;;  %v1891_v40 = vld [vmem:[#allocation12] ss:$0 sm:$0xff]  ;;  %s1576_s29 = sshll.u32 %s519_s10, 3  ;;  %s2194_s13 = smov 64  }
  0x45   : > { %636 = vmatpush.bf16.msra.mxu2 %v1736_v4  ;;  %v1753_v13 = vld [vmem:[%s2613_s2 + $0x28] sm:$0xff]  ;;  %v1755_v14 = vld [vmem:[%s2613_s2 + $0x38] sm:$0xff]  ;;  %717 = vmatpush.bf16.msra.mxu0 %v1741_v15  ;;  %v1752_v18 = vld [vmem:[%s2613_s2 + $0x20] sm:$0xff]  ;;  %s2195_s14 = smov 96   ;;  %s1764_s9 = sshll.u32 %s2175_s20, 5 }
  0x46   : > { %v1754_v19 = vld [vmem:[%s2613_s2 + $0x30] sm:$0xff]  ;;  %v1742_v20 = vld [vmem:[#allocation10 + $0x10] sm:$0xff]  ;;  %v1749_v22 = vld [vmem:[%s2613_s2 + $0x8] sm:$0xff]  ;;  %s1382_s26 = scalar_lea.hbm %s2589_s11, %s1764_s9  ;;  %s1383_s6 = sshll.u32 %s2478_s28, 4  ;;  %s1384_s6 = int_to_ptr.vmem [resolvable:$true] %s1383_s6 }
  0x47   : > { %1585 = vmatmul.msk.bf16.vlgmr.msra.gmra.mxu1 %vm575_vm0, %v530_v9  ;;  %1612 = vmatmul.msk.bf16.vlgmr.msra.gmra.mxu3 %vm575_vm0, %v530_v9  ;;  %v1751_v21 = vld [vmem:[%s2613_s2 + $0x18] sm:$0xff]  ;;  %v1750_v23 = vld [vmem:[%s2613_s2 + $0x10] sm:$0xff]  ;;  %v1748_v24 = vld [vmem:[%s2613_s2] sm:$0xff]  ;;  %s524_s7 = scalar_lea.vmem %s2614_s1, %s1576_s29  ;;  %s1355_s24 = scalar_lea.sflag [#allocation15], %s2370_s27 }
  0x48   : > { %792 = vmatpush.bf16.msrb.mxu3 %v1747_v7  ;;  %610 = vmatpush.bf16.msrb.mxu1 %v1735_v8  ;;  %v821_v25 = vld [vmem:[%s2374_s30] sm:$0xf]  ;;  %v1886_v54 = vld [vmem:[#allocation12 + $0x2] ss:$0 sm:$0xff]  ;;  %v1887_v56 = vld [vmem:[#allocation12 + $0x3] ss:$0 sm:$0xff] }
  0x49   : > { %767 = vmatpush.bf16.msrb.mxu2 %v1745_v6  ;;  %718 = vmatpush.bf16.msra.mxu0 %v1740_v17  ;;  %v1882_v26 = vld [vmem:[%s2583_s5] ss:$0 sm:$0xff]  ;;  %v1883_v30 = vld [vmem:[%s2583_s5 + $0x2] ss:$0 sm:$0xff]  ;;  %v1884_v31 = vld [vmem:[%s2583_s5 + $0x3] ss:$0 sm:$0xff] }
  0x4a   : > { %1603 = vmatmul.msk.bf16.vlgmr.msra.gmra.mxu2 %vm575_vm0, %v530_v9  ;;  %v1885_v42 = vld [vmem:[%s2583_s5 + $0x1] ss:$0 sm:$0xff]  ;;  %v1893_v59 = vld [vmem:[#allocation7] ss:$0 sm:$0xff]  ;;  %v1888_v8 = vld [vmem:[#allocation12 + $0x1] ss:$0 sm:$0xff] }
  0x4b   : > { %s2081_s3 = scalar_lea.hbm %s2589_s11, 64 }
  0x4c   : > { %611 = vmatpush.bf16.msrb.mxu1 %v1734_v11  ;;  %793 = vmatpush.bf16.msrb.mxu3 %v1746_v12 }
  0x4d   : > { %768 = vmatpush.bf16.msrb.mxu2 %v1744_v10  ;;  %1621 = vmatmul.msk.bf16.vlgmr.msra.gmra.mxu0 %vm575_vm0, %v530_v9 }
  0x4e   : > { %876 = vmatpush.bf16.msrb.mxu0 %v1749_v22 }
  0x50   : > { %951 = vmatpush.bf16.msra.mxu3 %v1755_v14  ;;  %742 = vmatpush.bf16.msra.mxu1 %v1743_v16 }
  0x51   : > { %926 = vmatpush.bf16.msra.mxu2 %v1753_v13 }
  0x52   : > { %877 = vmatpush.bf16.msrb.mxu0 %v1748_v24 }
  0x54   : > { %952 = vmatpush.bf16.msra.mxu3 %v1754_v19  ;;  %743 = vmatpush.bf16.msra.mxu1 %v1742_v20  ;;  %v1890_v20 = vld [vmem:[#allocation7 + $0x3] ss:$0 sm:$0xff] }
  0x55   : > { %927 = vmatpush.bf16.msra.mxu2 %v1752_v18  ;;  %v1889_v18 = vld [vmem:[#allocation7 + $0x2] ss:$0 sm:$0xff] }
  0x57   : > { %1594 = vmatmul.msk.bf16.vlgmr.msrb.gmra.mxu1 %vm575_vm0, %v530_v9  ;;  %1648 = vmatmul.msk.bf16.vlgmr.msrb.gmra.mxu3 %vm575_vm0, %v530_v9 }
  0x58   : > { %901 = vmatpush.bf16.msrb.mxu1 %v1751_v21 }
  0x5a   : > { %1639 = vmatmul.msk.bf16.vlgmr.msrb.gmra.mxu2 %vm575_vm0, %v530_v9 }
  0x5c   : > { %902 = vmatpush.bf16.msrb.mxu1 %v1750_v23 }
  0x5d   : > { %1657 = vmatmul.msk.bf16.vlgmr.msrb.gmra.mxu0 %vm575_vm0, %v821_v25 }
  0x67   : > { %1630 = vmatmul.msk.bf16.vlgmr.msra.gmra.mxu1 %vm575_vm0, %v530_v9  ;;  %1684 = vmatmul.msk.bf16.vlgmr.msra.gmra.mxu3 %vm575_vm0, %v821_v25 }
  0x6a   : > { %1675 = vmatmul.msk.bf16.vlgmr.msra.gmra.mxu2 %vm575_vm0, %v821_v25 }
  0x77   : > { %1666 = vmatmul.msk.bf16.vlgmr.msrb.gmra.mxu1 %vm575_vm0, %v821_v25 }
  0xc4   : > { %v588_v27 = vpop.f32.mrf.mxu1 }
  0xc5   : > { %v589_v28 = vadd.f32 %v1882_v26, %v588_v27 }
  0xc7   : > { %v799_v29 = vpack.c.bf16 %v589_v28, %v589_v28 }
  0xc9   : > { %804 = vst.msk [vmem:[#allocation2] sm:$0xf] %vm803_vm1, %v799_v29 }
  0xca   : > { %v663_v34 = vpop.f32.mrf.mxu3  ;;  %v720_v38 = vpop.f32.mrf.mxu0 }
  0xcb   : > { %v664_v35 = vadd.f32 %v1884_v31, %v663_v34  ;;  %v721_v41 = vadd.f32 %v1891_v40, %v720_v38  ;;  %v962_v40 = vld [vmem:[%s524_s7] sm:$0xff]  ;;  %s1385_s7 = sshll.u32 %s1382_s26, 4  ;;  %s1386_s7 = int_to_ptr.hbm [resolvable:$true] %s1385_s7 }
  0xcc   : > { %v590_v36 = vpop.f32.mrf.mxu1 }
  0xcd   : > { %v638_v32 = vpop.f32.mrf.mxu2  ;;  %v802_v39 = vpack.c.bf16 %v664_v35, %v664_v35  ;;  %v808_v45 = vpack.c.bf16 %v721_v41, %v721_v41  ;;  %v963_v41 = vmul.f32 -1e+09, %v962_v40 }
  0xce   : > { %v639_v33 = vadd.f32 %v1883_v30, %v638_v32  ;;  %v1892_v30 = vld [vmem:[#allocation7 + $0x1] ss:$0 sm:$0xff] }
  0xcf   : > { %807 = vst.msk [vmem:[#allocation2 + $0xc] sm:$0xf] %vm803_vm1, %v802_v39 }
  0xd0   : > { %v801_v37 = vpack.c.bf16 %v639_v33, %v639_v33  ;;  %v964_v43 = vld [vmem:[#allocation2] sm:$0xf]  ;;  %812 = vst.msk [vmem:[#allocation3] sm:$0xf] %vm803_vm1, %v808_v45 }
  0xd1   : > { %v972_v46 = vsel %vm575_vm0, %v964_v43, 0 }
  0xd2   : > { %806 = vst.msk [vmem:[#allocation2 + $0x8] sm:$0xf] %vm803_vm1, %v801_v37  ;;  %v665_v47 = vpop.f32.mrf.mxu3  ;;  %981 = vmatpush.bf16.xpose.msra.mxu0 %v972_v46  ;;  %v722_v50 = vpop.f32.mrf.mxu0 }
  0xd4   : > { %v613_v48 = vpop.f32.mrf.mxu1 }
  0xd5   : > { %v640_v44 = vpop.f32.mrf.mxu2  ;;  %v614_v49 = vadd.f32 %v1885_v42, %v613_v48 }
  0xd6   : > { %v967_v55 = vld [vmem:[#allocation2 + $0xc] sm:$0xf] }
  0xd7   : > { %v800_v52 = vpack.c.bf16 %v614_v49, %v614_v49  ;;  %v1029_v57 = vsel %vm575_vm0, %v967_v55, 0  ;;  %v1157_v0 = vld [vmem:[#allocation3] sm:$0xf] }
  0xd8   : > { %1038 = vmatpush.bf16.xpose.msrb.mxu3 %v1029_v57  ;;  %v1166_v3 = vsel %vm1164_vm2, %v1157_v0, 0 }
  0xd9   : > { %v966_v51 = vld [vmem:[#allocation2 + $0x8] sm:$0xf]  ;;  %805 = vst.msk [vmem:[#allocation2 + $0x4] sm:$0xf] %vm803_vm1, %v800_v52 }
  0xda   : > { %v1010_v53 = vsel %vm575_vm0, %v966_v51, 0  ;;  %v795_v61 = vpop.f32.mrf.mxu3  ;;  %v879_v2 = vpop.f32.mrf.mxu0  ;;  %1175 = vmatpush.bf16.msrb.mxu0 %v1166_v3 }
  0xdb   : > { %1019 = vmatpush.bf16.xpose.msrb.mxu2 %v1010_v53  ;;  %v796_v62 = vadd.f32 %v1887_v56, %v795_v61  ;;  %v880_v5 = vadd.f32 %v1893_v59, %v879_v2 }
  0xdc   : > { %v615_v63 = vpop.f32.mrf.mxu1 }
  0xdd   : > { %v770_v58 = vpop.f32.mrf.mxu2  ;;  %v811_v4 = vpack.c.bf16 %v796_v62, %v796_v62  ;;  %v958_v7 = vpack.c.bf16 %v880_v5, %v880_v5 }
  0xde   : > { %v771_v60 = vadd.f32 %v1886_v54, %v770_v58 }
  0xdf   : > { %815 = vst.msk [vmem:[#allocation3 + $0xc] sm:$0xf] %vm803_vm1, %v811_v4  ;;  %1685 = vmatmul.msk.bf16.vlgmr.msra.gmra.mxu0 %vm575_vm0, %v958_v7 }
  0xe0   : > { %v810_v1 = vpack.c.bf16 %v771_v60, %v771_v60  ;;  %v965_v6 = vld [vmem:[#allocation2 + $0x4] sm:$0xf] }
  0xe1   : > { %v991_v9 = vsel %vm575_vm0, %v965_v6, 0 }
  0xe2   : > { %814 = vst.msk [vmem:[#allocation3 + $0x8] sm:$0xf] %vm803_vm1, %v810_v1  ;;  %1000 = vmatpush.bf16.xpose.msra.mxu1 %v991_v9  ;;  %v797_v11 = vpop.f32.mrf.mxu3  ;;  %v881_v14 = vpop.f32.mrf.mxu0 }
  0xe4   : > { %v745_v12 = vpop.f32.mrf.mxu1 }
  0xe5   : > { %v772_v10 = vpop.f32.mrf.mxu2  ;;  %v746_v13 = vadd.f32 %v1888_v8, %v745_v12 }
  0xe6   : > { %v1160_v19 = vld [vmem:[#allocation3 + $0xc] sm:$0xf] }
  0xe7   : > { %v809_v16 = vpack.c.bf16 %v746_v13, %v746_v13  ;;  %v1223_v21 = vsel %vm1164_vm2, %v1160_v19, 0 }
  0xe8   : > { %1232 = vmatpush.bf16.msra.mxu3 %v1223_v21 }
  0xe9   : > { %v1159_v15 = vld [vmem:[#allocation3 + $0x8] sm:$0xf]  ;;  %813 = vst.msk [vmem:[#allocation3 + $0x4] sm:$0xf] %vm803_vm1, %v809_v16 }
  0xea   : > { %v1204_v17 = vsel %vm1164_vm2, %v1159_v15, 0  ;;  %v954_v24 = vpop.f32.mrf.mxu3 }
  0xeb   : > { %1213 = vmatpush.bf16.msra.mxu2 %v1204_v17  ;;  %v955_v25 = vadd.f32 %v1890_v20, %v954_v24 }
  0xec   : > { %v747_v26 = vpop.f32.mrf.mxu1 }
  0xed   : > { %v929_v22 = vpop.f32.mrf.mxu2  ;;  %v961_v28 = vpack.c.bf16 %v955_v25, %v955_v25 }
  0xee   : > { %v930_v23 = vadd.f32 %v1889_v18, %v929_v22 }
  0xef   : > { %1688 = vmatmul.msk.bf16.vlgmr.msrb.gmra.mxu3 %vm575_vm0, %v961_v28 }
  0xf0   : > { %v960_v27 = vpack.c.bf16 %v930_v23, %v930_v23  ;;  %v1158_v29 = vld [vmem:[#allocation3 + $0x4] sm:$0xf] }
  0xf1   : > { %v1185_v31 = vsel %vm1164_vm2, %v1158_v29, 0 }
  0xf2   : > { %1687 = vmatmul.msk.bf16.vlgmr.msrb.gmra.mxu2 %vm575_vm0, %v960_v27  ;;  %1194 = vmatpush.bf16.msrb.mxu1 %v1185_v31  ;;  %v956_v33 = vpop.f32.mrf.mxu3 }
  0xf4   : > { %v904_v34 = vpop.f32.mrf.mxu1 }
  0xf5   : > { %v931_v32 = vpop.f32.mrf.mxu2  ;;  %v905_v35 = vadd.f32 %v1892_v30, %v904_v34 }
  0xf7   : > { %v959_v36 = vpack.c.bf16 %v905_v35, %v905_v35 }
  0xf9   : > { %1686 = vmatmul.msk.bf16.vlgmr.msra.gmra.mxu1 %vm575_vm0, %v959_v36 }
  0xfc   : > { %v906_v37 = vpop.f32.mrf.mxu1 }
 0x15c   : > { %v983_v38 = vpop.f32.mrf.mxu0 }
 0x15d   : > { %v1044_v51 = vmul.f32 0.17677669, %v983_v38 }
 0x15f   : > { %v1048_v57 = vadd.f32 %v1044_v51, %v963_v41 }
 0x161   : > { %v1053_v59 = vsel %vm1052_vm3, %v1048_v57, -inf }
 0x164   : > { %v985_v39 = vpop.f32.mrf.mxu0 }
 0x172   : > { %v1040_v44 = vpop.f32.mrf.mxu3 }
 0x173   : > { %v1047_v45 = vmul.f32 0.17677669, %v1040_v44 }
 0x175   : > { %v1021_v42 = vpop.f32.mrf.mxu2  ;;  %v1051_v52 = vadd.f32 %v1047_v45, %v963_v41 }
 0x176   : > { %v1046_v43 = vmul.f32 0.17677669, %v1021_v42  ;;  %v1002_v47 = vpop.f32.mrf.mxu1 }
 0x177   : > { %v1045_v48 = vmul.f32 0.17677669, %v1002_v47  ;;  %v1062_v56 = vsel %vm1052_vm3, %v1051_v52, -inf }
 0x178   : > { %v1050_v46 = vadd.f32 %v1046_v43, %v963_v41 }
 0x179   : > { %v1049_v50 = vadd.f32 %v1045_v48, %v963_v41 }
 0x17a   : > { %v1059_v49 = vsel %vm1052_vm3, %v1050_v46, -inf  ;;  %v1042_v54 = vpop.f32.mrf.mxu3 }
 0x17b   : > { %1060 = vmax.xlane.f32.xlu0 %v1059_v49  ;;  %v1056_v55 = vsel %vm1052_vm3, %v1049_v50, -inf }
 0x17c   : > { %1057 = vmax.xlane.f32.xlu1 %v1056_v55 }
 0x17d   : > { %v1023_v53 = vpop.f32.mrf.mxu2 }
 0x17e   : > { %v1004_v58 = vpop.f32.mrf.mxu1 }
 0x183   : > { %1063 = vmax.xlane.f32.xlu0 %v1062_v56 }
 0x184   : > { %1054 = vmax.xlane.f32.xlu1 %v1053_v59 }
 0x1ee   : > { %v1061_v60 = vpop.xlane.xlu0 %1060 }
 0x1ef   : > { %v1067_v61 = vsub.f32 %v1050_v46, %v1061_v60  ;;  %v1058_v63 = vpop.xlane.xlu1 %1057 }
 0x1f0   : > { %v1066_v0 = vsub.f32 %v1049_v50, %v1058_v63 }
 0x1f1   : > { %v1073_v62 = vmul.f32 1.442695, %v1067_v61 }
 0x1f2   : > { %v1071_v1 = vmul.f32 1.442695, %v1066_v0 }
 0x1f3   : > { %1895 = vpow2.f32 %v1073_v62 }
 0x1f4   : > { %1897 = vpow2.f32 %v1071_v1 }
 0x1f6   : > { %v1064_v2 = vpop.xlane.xlu0 %1063 }
 0x1f7   : > { %v1068_v3 = vsub.f32 %v1051_v52, %v1064_v2  ;;  %v1055_v6 = vpop.xlane.xlu1 %1054 }
 0x1f8   : > { %v1065_v8 = vsub.f32 %v1048_v57, %v1055_v6 }
 0x1f9   : > { %v1896_v4 = vpop.eup %1895  ;;  %v1075_v5 = vmul.f32 1.442695, %v1068_v3 }
 0x1fa   : > { %v1083_v7 = vsel %vm1052_vm3, %v1896_v4, 0.0  ;;  %v1898_v9 = vpop.eup %1897  ;;  %v1069_v10 = vmul.f32 1.442695, %v1065_v8 }
 0x1fb   : > { %1899 = vpow2.f32 %v1075_v5  ;;  %1084 = vadd.xlane.f32.xlu2 %v1083_v7  ;;  %v1080_v11 = vsel %vm1052_vm3, %v1898_v9, 0.0 }
 0x1fc   : > { %1901 = vpow2.f32 %v1069_v10  ;;  %1081 = vadd.xlane.f32.xlu0 %v1080_v11 }
 0x201   : > { %v2469_v12 = vpop.eup %1899 }
 0x202   : > { %v1086_v13 = vsel %vm1052_vm3, %v2469_v12, 0.0  ;;  %v2473_v14 = vpop.eup %1901 }
 0x203   : > { %1087 = vadd.xlane.f32.xlu2 %v1086_v13  ;;  %v1077_v15 = vsel %vm1052_vm3, %v2473_v14, 0.0 }
 0x204   : > { %1078 = vadd.xlane.f32.xlu1 %v1077_v15 }
 0x26e   : > { %v1085_v16 = vpop.xlane.xlu2 %1084 }
 0x26f   : > { %1903 = vrcp.f32 %v1085_v16  ;;  %v1082_v17 = vpop.xlane.xlu0 %1081  ;;  %v1128_v23 = vand.u32 2147483647, %v1085_v16  ;;  %v1130_v24 = vand.u32 2147483648, %v1085_v16  ;;  %vm1124_vm5 = vweird.f32 %v1085_v16 }
 0x270   : > { %1905 = vrcp.f32 %v1082_v17  ;;  %v1113_v32 = vand.u32 2147483647, %v1082_v17  ;;  %v1115_v33 = vand.u32 2147483648, %v1082_v17  ;;  %vm1109_vm9 = vweird.f32 %v1082_v17 }
 0x271   : > { %vm1129_vm7 = vcmp.eq.f32.partialorder %v1128_v23, 8.507059e+37  ;;  %v1131_v31 = vor.u32 1.1754944e-38, %v1130_v24  ;;  %v1761_v23 = vld [vmem:[%s2586_s8 + $0x28] sm:$0xff]  ;;  %v1760_v24 = vld [vmem:[%s2586_s8 + $0x20] sm:$0xff] }
 0x272   : > { %vm1114_vm11 = vcmp.eq.f32.partialorder %v1113_v32, 8.507059e+37  ;;  %v1116_v42 = vor.u32 1.1754944e-38, %v1115_v33 }
 0x275   : > { %v1904_v18 = vpop.eup %1903 }
 0x276   : > { %v1120_v19 = vmul.f32 %v1904_v18, %v1085_v16  ;;  %v1088_v20 = vpop.xlane.xlu2 %1087  ;;  %v1906_v22 = vpop.eup %1905  ;;  %vm1125_vm4 = vweird.f32 %v1904_v18 }
 0x277   : > { %1907 = vrcp.f32 %v1088_v20  ;;  %v1105_v26 = vmul.f32 %v1906_v22, %v1082_v17  ;;  %v1079_v27 = vpop.xlane.xlu1 %1078  ;;  %vm1126_vm6 = vmor %vm1124_vm5, %vm1125_vm4  ;;  %vm1110_vm8 = vweird.f32 %v1906_v22  ;;  %v1143_v43 = vand.u32 2147483647, %v1088_v20 }
 0x278   : > { %v1121_v21 = vsub.f32 1.0, %v1120_v19  ;;  %1909 = vrcp.f32 %v1079_v27  ;;  %vm1111_vm10 = vmor %vm1109_vm9, %vm1110_vm8  ;;  %v1145_v44 = vand.u32 2147483648, %v1088_v20  ;;  %vm1139_vm13 = vweird.f32 %v1088_v20 }
 0x279   : > { %v1106_v29 = vsub.f32 1.0, %v1105_v26  ;;  %vm1144_vm15 = vcmp.eq.f32.partialorder %v1143_v43, 8.507059e+37  ;;  %v1098_v54 = vand.u32 2147483647, %v1079_v27  ;;  %v1100_v55 = vand.u32 2147483648, %v1079_v27  ;;  %v1758_v26 = vld [vmem:[%s2586_s8 + $0x10] sm:$0xff] }
 0x27a   : > { %v1122_v25 = vmul.f32 %v1904_v18, %v1121_v21  ;;  %v1146_v53 = vor.u32 1.1754944e-38, %v1145_v44  ;;  %vm1094_vm2 = vweird.f32 %v1079_v27  ;;  %v1763_v21 = vld [vmem:[%s2586_s8 + $0x38] sm:$0xff] }
 0x27b   : > { %v1107_v35 = vmul.f32 %v1906_v22, %v1106_v29  ;;  %v1101_v62 = vor.u32 1.1754944e-38, %v1100_v55  ;;  %vm1099_vm5 = vcmp.eq.f32.partialorder %v1098_v54, 8.507059e+37  ;;  %1335 = vmatpush.bf16.msra.mxu0 %v1763_v21 }
 0x27c   : > { %v1123_v28 = vadd.f32 %v1904_v18, %v1122_v25  ;;  %v1759_v25 = vld [vmem:[%s2586_s8 + $0x18] sm:$0xff] }
 0x27d   : > { %v1908_v30 = vpop.eup %1907  ;;  %v1108_v39 = vadd.f32 %v1906_v22, %v1107_v35 }
 0x27e   : > { %v1127_v34 = vsel %vm1126_vm6, %v1904_v18, %v1123_v28  ;;  %v1135_v36 = vmul.f32 %v1908_v30, %v1088_v20  ;;  %v1910_v41 = vpop.eup %1909  ;;  %vm1140_vm12 = vweird.f32 %v1908_v30  ;;  %v1756_v28 = vld [vmem:[%s2586_s8] sm:$0xff]  ;;  %vm1263_vm6 = vcmask 785408  }
 0x27f   : > { %v1132_v37 = vsel %vm1129_vm7, %v1131_v31, %v1127_v34  ;;  %v1112_v45 = vsel %vm1111_vm10, %v1906_v22, %v1108_v39  ;;  %v1090_v47 = vmul.f32 %v1910_v41, %v1079_v27  ;;  %vm1141_vm14 = vmor %vm1139_vm13, %vm1140_vm12  ;;  %vm1095_vm1 = vweird.f32 %v1910_v41  ;;  %v1762_v22 = vld [vmem:[%s2586_s8 + $0x30] sm:$0xff]  ;;  %v1757_v27 = vld [vmem:[%s2586_s8 + $0x8] sm:$0xff] }
 0x280   : > { %v1133_v38 = vmul.f32 %v1896_v4, %v1132_v37  ;;  %v1136_v40 = vsub.f32 1.0, %v1135_v36  ;;  %v1117_v48 = vsel %vm1114_vm11, %v1116_v42, %v1112_v45  ;;  %vm1096_vm4 = vmor %vm1094_vm2, %vm1095_vm1  ;;  %1336 = vmatpush.bf16.msra.mxu0 %v1762_v22 }
 0x281   : > { %v1118_v50 = vmul.f32 %v1898_v9, %v1117_v48  ;;  %v1091_v52 = vsub.f32 1.0, %v1090_v47 }
 0x282   : > { %1151 = vst.msk [vmem:[%s2478_s28 + $0x10] sm:$0xff] %vm1052_vm3, %v1133_v38  ;;  %v1137_v46 = vmul.f32 %v1908_v30, %v1136_v40  ;;  %v1155_v49 = vpack.c.bf16 %v1133_v38, %v1133_v38 }
 0x283   : > { %1150 = vst.msk [vmem:[%s2478_s28 + $0x8] sm:$0xff] %vm1052_vm3, %v1118_v50  ;;  %v1092_v57 = vmul.f32 %v1910_v41, %v1091_v52  ;;  %v1154_v58 = vpack.c.bf16 %v1118_v50, %v1118_v50 }
 0x284   : > { %v1138_v51 = vadd.f32 %v1908_v30, %v1137_v46  ;;  %1691 = vmatmul.msk.bf16.vlgmr.msra.gmra.mxu2 %vm1052_vm3, %v1155_v49  ;;  %1337 = vmatpush.bf16.msra.mxu0 %v1761_v23 }
 0x285   : > { %v1093_v61 = vadd.f32 %v1910_v41, %v1092_v57  ;;  %1690 = vmatmul.msk.bf16.vlgmr.msrb.gmra.mxu1 %vm1052_vm3, %v1154_v58 }
 0x286   : > { %v1142_v56 = vsel %vm1141_vm14, %v1908_v30, %v1138_v51 }
 0x287   : > { %v1147_v59 = vsel %vm1144_vm15, %v1146_v53, %v1142_v56  ;;  %v1097_v63 = vsel %vm1096_vm4, %v1910_v41, %v1093_v61 }
 0x288   : > { %v1148_v60 = vmul.f32 %v2469_v12, %v1147_v59  ;;  %v1102_v1 = vsel %vm1099_vm5, %v1101_v62, %v1097_v63  ;;  %1338 = vmatpush.bf16.msra.mxu0 %v1760_v24 }
 0x289   : > { %v1103_v2 = vmul.f32 %v2473_v14, %v1102_v1 }
 0x28a   : > { %1152 = vst.msk [vmem:[%s2478_s28 + $0x18] sm:$0xff] %vm1052_vm3, %v1148_v60  ;;  %v1156_v0 = vpack.c.bf16 %v1148_v60, %v1148_v60 }
 0x28b   : > { %1149 = vst.msk [vmem:[%s2478_s28] sm:$0xff] %vm1052_vm3, %v1103_v2  ;;  %v1153_v3 = vpack.c.bf16 %v1103_v2, %v1103_v2 }
 0x28c   : > { %1692 = vmatmul.msk.bf16.vlgmr.msra.gmra.mxu3 %vm1052_vm3, %v1156_v0  ;;  %1339 = vmatpush.bf16.msra.mxu0 %v1759_v25 }
 0x28d   : > { %1689 = vmatmul.msk.bf16.vlgmr.msrb.gmra.mxu0 %vm1052_vm3, %v1153_v3  ;;  %vm1260_vm3 = vcmask 523264  }
 0x290   : > { %1340 = vmatpush.bf16.msra.mxu0 %v1758_v26 }
 0x294   : > { %1341 = vmatpush.bf16.msra.mxu0 %v1757_v27 }
 0x298   : > { %1342 = vmatpush.bf16.msra.mxu0 %v1756_v28 }
 0x302   : > { %v1196_v4 = vpop.f32.mrf.mxu1 }
 0x303   : > { %v1239_v5 = vpack.c.bf16 %v1196_v4, %v1196_v4 }
 0x305   : > { %v1243_v6 = vunpack.c.l.b16 %v1239_v5 }
 0x307   : > { %v1215_v7 = vpop.f32.mrf.mxu2  ;;  %v1244_v9 = vpack.c.b16 %v1243_v6, %v1243_v6 }
 0x308   : > { %v1240_v8 = vpack.c.bf16 %v1215_v7, %v1215_v7 }
 0x309   : > { %1245 = vrot.lane.b32.xlu2 %v1244_v9, %s2193_s4  ;;  %s2075_s4 = sshra.s32 %s1386_s7, 4  ;;  %s2076_s4 = int_to_ptr.hbm [resolvable:$true] %s2075_s4 }
 0x30a   : > { %v1248_v10 = vunpack.c.l.b16 %v1240_v8  ;;  %v1177_v12 = vpop.f32.mrf.mxu0  ;;  %v1198_v13 = vpop.f32.mrf.mxu1  ;;  %p2082_p10 = scmp.lt.s32.totalorder %s2076_s4, %s2589_s11 }
 0x30b   : > { %v1238_v30 = vpack.c.bf16 %v1177_v12, %v1177_v12 }
 0x30c   : > { %v1249_v11 = vpack.c.b16 %v1248_v10, %v1248_v10 }
 0x30e   : > { %1250 = vrot.lane.b32.xlu0 %v1249_v11, %s2194_s13  ;;  %s2077_s13 = scalar_lea.hbm %s2076_s4, 32 }
 0x30f   : > { %v1234_v14 = vpop.f32.mrf.mxu3  ;;  %v1217_v15 = vpop.f32.mrf.mxu2  ;;  %p2078_p3 = scmp.ne.s32.totalorder %s2076_s4, %s2077_s13  ;;  %p2083_p12 = scmp.lt.s32.totalorder %s2081_s3, %s2077_s13 }
 0x310   : > { %v1241_v16 = vpack.c.bf16 %v1234_v14, %v1234_v14 }
 0x311   : > { %p2079_p8 = pnand %p2078_p3, %p2350_p0  ;;  %p2084_p13 = por %p2083_p12, %p2082_p10 }
 0x312   : > { %v1253_v17 = vunpack.c.l.b16 %v1241_v16  ;;  %v1179_v19 = vpop.f32.mrf.mxu0 }
 0x313   : > { %p2080_p9 = pneg %p2079_p8 }
 0x314   : > { %v1254_v18 = vpack.c.b16 %v1253_v17, %v1253_v17 }
 0x315   : > { %p2085_p2 = pnand %p2084_p13, %p2080_p9 }
 0x316   : > { %1255 = vrot.lane.b32.xlu1 %v1254_v18, %s2195_s14 }
 0x317   : > { %v1236_v20 = vpop.f32.mrf.mxu3 }
 0x363   : > { %v1246_v29 = vpop.permute.xlu2 %1245 }
 0x364   : > { %v1259_v32 = vsel %vm575_vm0, %v1238_v30, %v1246_v29 }
 0x380   : > { %v1251_v31 = vpop.permute.xlu0 %1250 }
 0x381   : > { %v1262_v33 = vsel %vm1260_vm3, %v1259_v32, %v1251_v31 }
 0x388   : > { %v1256_v34 = vpop.permute.xlu1 %1255 }
 0x389   : > { %v1265_v35 = vsel %vm1263_vm6, %v1262_v33, %v1256_v34 }
 0x38a   : > { %1343 = vmatmul.bf16.vlgmr.msra.gmra.mxu0 %v1265_v35 }
 0x38b   : > { %2088 = shalt.err (!%p2085_p2)
}
 0x38c   : > { %s2196_s28 = smov 128   ;;  %s2197_s9 = smov 8  }
 0x38d   : > { %1784 = dma.vmem_to_hbm [thread:$0]  (%p2350_p0), %s1384_s6, 512, %s1386_s7, %s1355_s24, %s2196_s28, %s2196_s28, %s2197_s9  }
 0x38e   : > { %s1727_s10 = sshll.u32 %s2175_s20, 3  ;;  %s1574_s29 = sshll.u32 %s2370_s27, 3 }
 0x38f   : > { %s2615_s30 = sld [smem:[#allocation29_spill]]  ;;  %s510_s23 = scalar_lea.vmem [#allocation13], %s1574_s29 }
 0x390   : > { %s2616_s3 = sld [smem:[#allocation28_spill]]  ;;  %s1368_s1 = sshll.u32 %s510_s23, 4  ;;  %s1369_s1 = int_to_ptr.vmem [resolvable:$true] %s1368_s1 }
 0x391   : > { %s1350_s20 = scalar_lea.sflag [#allocation6], %s2370_s27 }
 0x395   : > { %s1366_s0 = scalar_lea.hbm %s2615_s30, %s1727_s10  ;;  %s2109_s9 = scalar_lea.hbm %s2615_s30, 16 }
 0x396   : > { %v1894_v36 = vld [vmem:[%s2616_s3] ss:$0 sm:$0xff]  ;;  %s1370_s2 = sshll.u32 %s1366_s0, 4  ;;  %s1371_s2 = int_to_ptr.hbm [resolvable:$true] %s1370_s2 }
 0x397   : > { %s2103_s6 = sshra.s32 %s1371_s2, 4  ;;  %s2104_s6 = int_to_ptr.hbm [resolvable:$true] %s2103_s6 }
 0x398   : > { %s2105_s7 = scalar_lea.hbm %s2104_s6, 8  ;;  %p2110_p1 = scmp.lt.s32.totalorder %s2104_s6, %s2615_s30 }
 0x399   : > { %p2106_p4 = scmp.ne.s32.totalorder %s2104_s6, %s2105_s7  ;;  %p2111_p3 = scmp.lt.s32.totalorder %s2109_s9, %s2105_s7 }
 0x39b   : > { %p2107_p7 = pnand %p2106_p4, %p2350_p0  ;;  %p2112_p8 = por %p2111_p3, %p2110_p1 }
 0x39d   : > { %p2108_p11 = pneg %p2107_p7 }
 0x39f   : > { %p2113_p9 = pnand %p2112_p8, %p2108_p11 }
 0x407   : > { %v1344_v37 = vpop.f32.mrf.mxu0 }
 0x408   : > { %v1345_v38 = vadd.f32 %v1894_v36, %v1344_v37 }
 0x40a   : > { %1348 = vst.msk [vmem:[%s510_s23] sm:$0xff] %vm575_vm0, %v1345_v38 }
 0x40b   : > { %2116 = shalt.err (!%p2113_p9)
}
 0x40c   : > { %1783 = dma.vmem_to_hbm [thread:$0]  (%p2350_p0), %s1369_s1, 128, %s1371_s2, %s1350_s20  }
 0x40f   : > { %v1346_v39 = vpop.f32.mrf.mxu0 }
 0x410 PF: > { %s1400_s27 = sand.u32 1, %s2163_s17   ;;  %p1805_p10 = pnand %p1565_p6, %p2357_p5 }
 0x411   : > { %s1401_s26 = scalar_lea.sflag [#allocation6], %s1400_s27 }
 0x412   : > { %p1806_p12 = pneg %p1805_p10 }
 0x414   : > { %2154 = dma.done.wait (%p1806_p12), %s1401_s26, 128  }
 0x415   : > { %2156 = vsyncadd (%p1806_p12), %s1401_s26, 4294967168  ;;  %s1411_s14 = scalar_lea.sflag [#allocation15], %s1400_s27 }
 0x416   : > { %2158 = dma.done.wait (%p1806_p12), %s1411_s14, 512  }
 0x417   : > { %2160 = vsyncadd (%p1806_p12), %s1411_s14, 4294966784  ;;  %s33_s22 = sadd.s32 1, %s2183_s22   ;;  %s2617_s17 = smov %s2167_s18 }
 0x418   : > { %p30_p13 = scmp.ge.s32.totalorder %s33_s22, 4   ;;  %s2618_s18 = smov %s2171_s19 }
 0x419   : > { %s2619_s19 = smov %s2355_s16  ;;  %s2620_s20 = smov %s2179_s21 }
 0x41a   : > { %s2621_s21 = smov %s2623_s15  ;;  %32 = sbr.rel (!%p30_p13) target bundleno = 20 (0x14), region = 146 }
 0x41f   :  { %1417 = vsyncpa [#allocation5], 1 }
 0x420   :  { %1419 = vsyncpa [#allocation5 + $0x1], 1 }
 0x421   :  { %1420 = vsyncpa [#allocation8], 1 }
 0x422   :  { %1421 = vsyncpa [#allocation11], 1 }
 0x423   :  { %1422 = vsyncpa [#allocation6], 1 }
 0x424   :  { %1424 = vsyncpa [#allocation6 + $0x1], 1 }
 0x425   :  { %1425 = vsyncpa [#allocation15], 1 }
 0x426   :  { %1427 = vsyncpa [#allocation15 + $0x1], 1 }

</bundles_post_ra>
